<compile_context>
chip_gen: v6e
topology: v6e:2x2x1
jax: 0.10.0
libtpu: 0.0.40
codegen_flags: <defaults>
</compile_context>

<pallas_src>
import functools

import jax
import jax.numpy as jnp
from jax.experimental import pallas as pl
from jax.experimental.pallas import tpu as pltpu

_MIB = 1 << 20
# Weight stacks up to this size use the fully-VMEM-resident path.
_RESIDENT_STACK_LIMIT_BYTES = 40 * _MIB
# Below this, double-buffering the (constant-index) weight stack wastes little
# VMEM, so stay on the default (most common) pipelining path.
_SINGLE_BUFFER_MIN_BYTES = 2 * _MIB
# Target weight-strip size for the streamed path (v7x-safe; v5e/v6e could use
# larger strips to shave per-step overhead).
_DEFAULT_STRIP_BYTES = 8 * _MIB


# ---------------------------------------------------------------------------
# Small helpers
# ---------------------------------------------------------------------------
def _vmem_limit(need_bytes):
    """Scoped-VMEM request: actual need + headroom, never below the default."""
    return int(min(max(need_bytes + 4 * _MIB, 32 * _MIB), 100 * _MIB))


def _pick_tm(m, preferred=256):
    """Batch tile: a multiple of 8 dividing M, close to `preferred` (256 keeps
    the 2x256 MXUs of v6e/v7x full; v5e is already fine at <=256).  When the
    whole batch fits one tile, split in two so the "parallel" batch axis has
    >= 2 grid steps for v7x's two TensorCores."""
    tm = min(preferred, m)
    while tm > 8 and m % tm:
        tm -= 8
    if m % tm:
        tm = m                      # ragged small batch: single full-M tile
    if tm == m and m >= 16 and m % 2 == 0 and (m // 2) % 8 == 0:
        tm = m // 2                 # give megacore two steps to shard
    return tm


def _pick_tn(d, tn=None, strip_bytes=_DEFAULT_STRIP_BYTES):
    """Output-strip width for the streamed path: multiple of 128 dividing D."""
    if tn is None:
        tn = max(128, (strip_bytes // (d * 2)) // 128 * 128)
        tn = min(tn, d)
    if tn != d:
        tn = max(128, (tn // 128) * 128)
        while tn > 128 and d % tn:
            tn -= 128
        if tn < 128 or d % tn:
            tn = d
    assert d % tn == 0 and (tn % 128 == 0 or tn == d)
    return tn


# ---------------------------------------------------------------------------
# Path 1: fully VMEM-resident weight stack (small / medium D).
# ---------------------------------------------------------------------------
def _resident_mlp_kernel(x_ref, w_ref, b_ref, o_ref, *, num_layers):
    """All weights VMEM-resident; statically unrolled layers, bf16 activations,
    f32 accumulation + f32 bias, ReLU fused on hidden layers."""
    h = x_ref[...].astype(jnp.bfloat16)                 # MXU input dtype
    for l in range(num_layers):                         # static unroll
        y = jnp.dot(h, w_ref[l], preferred_element_type=jnp.float32) + b_ref[l]
        if l != num_layers - 1:
            h = jnp.maximum(y, 0.0).astype(jnp.bfloat16)
        else:
            h = y
    o_ref[...] = h.astype(o_ref.dtype)


def _forward_resident(w_stack, b_stack, x, *, tm):
    num_layers, d, _ = w_stack.shape
    m = x.shape[0]
    stack_bytes = num_layers * d * d * 2
    # Constant index_map => the stack is never re-fetched; single-buffer it so
    # it occupies 1x (not 2x) its size in VMEM once that actually matters.
    single_buffer = stack_bytes >= _SINGLE_BUFFER_MIN_BYTES

    def const_spec(shape):
        idx = lambda i: (0,) * len(shape)
        if single_buffer:
            return pl.BlockSpec(shape, idx, pipeline_mode=pl.Buffered(1))
        return pl.BlockSpec(shape, idx)

    act_bytes = tm * d * x.dtype.itemsize
    need = (stack_bytes * (1 if single_buffer else 2)
            + b_stack.size * 4 * 2
            + act_bytes * 2 * 2          # x + out tiles, double-buffered
            + 2 * tm * d * 4)            # in-kernel f32 intermediates

    kernel = functools.partial(_resident_mlp_kernel, num_layers=num_layers)
    return pl.pallas_call(
        kernel,
        out_shape=jax.ShapeDtypeStruct((m, d), x.dtype),
        grid_spec=pltpu.PrefetchScalarGridSpec(
            num_scalar_prefetch=0,
            grid=(m // tm,),                                       # batch tiles only
            in_specs=[
                pl.BlockSpec((tm, d), lambda i: (i, 0)),           # activation tile
                const_spec((num_layers, d, d)),                    # weights (resident)
                const_spec((num_layers, 1, d)),                    # biases  (resident)
            ],
            out_specs=pl.BlockSpec((tm, d), lambda i: (i, 0)),
        ),
        compiler_params=pltpu.CompilerParams(
            dimension_semantics=("parallel",),
            vmem_limit_bytes=_vmem_limit(need),
        ),
    )(x, w_stack, b_stack)


# ---------------------------------------------------------------------------
# Path 2: streamed per-layer weight strips (real D = 4096 regime).
# ---------------------------------------------------------------------------
def _streamed_mlp_kernel(x_ref, w_ref, b_ref, o_ref, h_ref, y_ref, *,
                         num_layers, tn):
    """Grid = (batch tile, layer, output strip).  Weight strips are streamed
    (double-buffered by the grid pipeline) while the inter-layer activation is
    carried across layers in a persistent bf16 VMEM scratch."""
    l = pl.program_id(1)
    j = pl.program_id(2)
    num_strips = pl.num_programs(2)
    last_layer = l == num_layers - 1

    # Start of a batch row: load the input tile into the carried activation.
    @pl.when(jnp.logical_and(l == 0, j == 0))
    def _():
        h_ref[...] = x_ref[...].astype(h_ref.dtype)

    # One output strip of the current layer (full-K matmul, f32 accumulate).
    y = jnp.dot(h_ref[...], w_ref[0], preferred_element_type=jnp.float32) + b_ref[0]

    @pl.when(last_layer)
    def _():
        o_ref[...] = y.astype(o_ref.dtype)

    @pl.when(jnp.logical_not(last_layer))
    def _():
        # Hidden layer: ReLU, stash strip into the next-activation scratch.
        # (The output block written back for this step is stale; every output
        #  block is rewritten correctly on its final visit at the last layer.)
        off = pl.multiple_of(j * tn, tn)
        y_ref[:, pl.ds(off, tn)] = jnp.maximum(y, 0.0).astype(y_ref.dtype)

    # End of a hidden layer: commit the freshly built activation for layer l+1.
    @pl.when(jnp.logical_and(jnp.logical_not(last_layer), j == num_strips - 1))
    def _():
        h_ref[...] = y_ref[...]


def _forward_streamed(w_stack, b_stack, x, *, tm, tn=None):
    num_layers, d, _ = w_stack.shape
    m = x.shape[0]
    tn = _pick_tn(d, tn)

    need = (d * tn * 2 * 2                      # weight strip, double-buffered
            + tn * 4 * 2                        # bias strip
            + tm * d * x.dtype.itemsize * 2     # x tile
            + tm * tn * x.dtype.itemsize * 2    # out tile
            + 2 * tm * d * 2                    # h / y bf16 scratches
            + tm * tn * 4)                      # f32 strip intermediate

    kernel = functools.partial(_streamed_mlp_kernel, num_layers=num_layers, tn=tn)
    return pl.pallas_call(
        kernel,
        out_shape=jax.ShapeDtypeStruct((m, d), x.dtype),
        grid_spec=pltpu.PrefetchScalarGridSpec(
            num_scalar_prefetch=0,
            grid=(m // tm, num_layers, d // tn),
            in_specs=[
                pl.BlockSpec((tm, d), lambda i, l, j: (i, 0)),       # x tile (resident per row)
                pl.BlockSpec((1, d, tn), lambda i, l, j: (l, 0, j)),  # weight strip (streamed)
                pl.BlockSpec((1, 1, tn), lambda i, l, j: (l, 0, j)),  # bias strip
            ],
            out_specs=pl.BlockSpec((tm, tn), lambda i, l, j: (i, j)),
            scratch_shapes=[
                pltpu.VMEM((tm, d), jnp.bfloat16),   # carried activation
                pltpu.VMEM((tm, d), jnp.bfloat16),   # next-layer activation
            ],
        ),
        compiler_params=pltpu.CompilerParams(
            dimension_semantics=("parallel", "arbitrary", "arbitrary"),
            vmem_limit_bytes=_vmem_limit(need),
        ),
    )(x, w_stack, b_stack)


# ---------------------------------------------------------------------------
# Fallback: single fused Linear(+ReLU) kernel for non-uniform layer widths.
# Batch axis is the innermost grid axis so the (K, tn) weight strip stays
# VMEM-resident across batch tiles (weight-bandwidth-bound regime).
# ---------------------------------------------------------------------------
def _linear_kernel(x_ref, w_ref, b_ref, o_ref, *, apply_relu):
    y = jnp.dot(x_ref[...].astype(w_ref.dtype), w_ref[...],
                preferred_element_type=jnp.float32) + b_ref[...]
    if apply_relu:
        y = jnp.maximum(y, 0.0)
    o_ref[...] = y.astype(o_ref.dtype)


def pallas_linear(x, w, b, *, apply_relu, tm=256, tn=512):
    """y = relu?(x @ w + b), x:(M,K), w:(K,N), b:(N,); full-K per tile."""
    # TODO(synk): for hot-path use, pre-cast w to bf16 outside this wrapper.
    m, k = x.shape
    k2, n = w.shape
    assert k == k2 and b.shape == (n,)
    tm = _pick_tm(m, tm)
    tn = min(tn, n)
    assert m % tm == 0 and n % tn == 0
    need = (k * tn * 2 * 2 + tm * k * 4 * 2 + tm * tn * 4 * 2
            + tn * 4 * 2 + tm * tn * 4)
    kernel = functools.partial(_linear_kernel, apply_relu=apply_relu)
    return pl.pallas_call(
        kernel,
        out_shape=jax.ShapeDtypeStruct((m, n), x.dtype),
        grid_spec=pltpu.PrefetchScalarGridSpec(
            num_scalar_prefetch=0,
            grid=(n // tn, m // tm),                               # batch innermost
            in_specs=[
                pl.BlockSpec((tm, k), lambda j, i: (i, 0)),
                pl.BlockSpec((k, tn), lambda j, i: (0, j)),
                pl.BlockSpec((1, tn), lambda j, i: (0, j)),
            ],
            out_specs=pl.BlockSpec((tm, tn), lambda j, i: (i, j)),
        ),
        compiler_params=pltpu.CompilerParams(
            dimension_semantics=("parallel", "parallel"),
            vmem_limit_bytes=_vmem_limit(need),
        ),
    )(x, w.astype(jnp.bfloat16), b.reshape(1, n))


# ---------------------------------------------------------------------------
# Parameters + forward API (matches Deep: (Linear+ReLU)*(len-2) then Linear).
# ---------------------------------------------------------------------------
def init_deep_params(key, layers):
    """Mirrors nn.Linear's U(-1/sqrt(fan_in), 1/sqrt(fan_in)) init."""
    params = []
    for i in range(len(layers) - 1):
        fan_in, fan_out = layers[i], layers[i + 1]
        key, kw, kb = jax.random.split(key, 3)
        bound = 1.0 / jnp.sqrt(jnp.float32(fan_in))
        # stored as (in, out) == PyTorch weight (out, in) transposed
        w = jax.random.uniform(kw, (fan_in, fan_out), jnp.float32, -bound, bound)
        b = jax.random.uniform(kb, (fan_out,), jnp.float32, -bound, bound)
        params.append((w, b))
    return params


def prepare_deep_params(params):
    """Hoisted out of the hot path: stack + cast ONCE.  Returns the (L, D, D)
    bf16 weight stack and (L, 1, D) f32 bias stack the kernels consume, so the
    per-step forward does no HBM repacking."""
    w_stack = jnp.stack([w for w, _ in params]).astype(jnp.bfloat16)
    b_stack = jnp.stack([b.reshape(1, -1).astype(jnp.float32) for _, b in params])
    return w_stack, b_stack


def deep_forward_stacked(w_stack, b_stack, x, *, tm=256, tn=None):
    """Fused forward for a uniform-width MLP given pre-stacked params."""
    num_layers, d, d2 = w_stack.shape
    assert d == d2 and x.shape[1] == d and b_stack.shape == (num_layers, 1, d)
    if w_stack.dtype != jnp.bfloat16:        # safety net; prepare once instead
        w_stack = w_stack.astype(jnp.bfloat16)
    tm_eff = _pick_tm(x.shape[0], tm)
    stack_bytes = num_layers * d * d * 2
    if stack_bytes <= _RESIDENT_STACK_LIMIT_BYTES:
        return _forward_resident(w_stack, b_stack, x, tm=tm_eff)
    return _forward_streamed(w_stack, b_stack, x, tm=tm_eff, tn=tn)


def deep_forward(params, x, *, tm=256):
    """Convenience API on raw per-layer params (stacks every call — for the
    training hot path call prepare_deep_params once and use
    deep_forward_stacked instead)."""
    dims = [params[0][0].shape[0]] + [w.shape[1] for w, _ in params]
    if all(d == dims[0] for d in dims):
        w_stack, b_stack = prepare_deep_params(params)
        return deep_forward_stacked(w_stack, b_stack, x, tm=tm)
    # TODO(synk): non-uniform widths use per-layer fused Linear kernels instead
    # of the single fully-fused call (could be unified via zero-padding).
    n = len(params)
    for idx, (w, b) in enumerate(params):
        x = pallas_linear(x, w, b, apply_relu=idx != n - 1)
    return x


def deep_forward_ref(params, x):
    """Pure-JAX reference mirroring the kernel's bf16-weight / f32-acc numerics."""
    n = len(params)
    h = x
    for idx, (w, b) in enumerate(params):
        h = jnp.dot(h.astype(jnp.bfloat16), w.astype(jnp.bfloat16),
                    preferred_element_type=jnp.float32) + b
        if idx != n - 1:
            h = jnp.maximum(h, 0.0)
    return h


if __name__ == "__main__":
    # dmrg.py: LAYERS = [hidden]*(num_hidden_layers+2) = 7 entries => 6 Linear
    # layers (5 hidden Linear+ReLU + output Linear); hidden 4096 -> 256 here.
    layers = [256] * 7
    batch = 16

    key = jax.random.PRNGKey(0)
    key, kx = jax.random.split(key)
    x = jax.random.normal(kx, (batch, layers[0]), jnp.float32)
    params = init_deep_params(key, layers)

    # Hot-path usage: stack/cast parameters once, jit the fused forward.
    w_stack, b_stack = prepare_deep_params(params)
    fwd = jax.jit(deep_forward_stacked)
    y = jax.block_until_ready(fwd(w_stack, b_stack, x))

    y_ref = deep_forward_ref(params, x)
    assert y.shape == (batch, layers[-1])
    assert jnp.allclose(y, y_ref, atol=1e-2, rtol=1e-2), float(
        jnp.max(jnp.abs(y - y_ref)))

    # Also exercise the streamed (weight-strip) path used for the real D=4096
    # configuration, forcing multiple strips per layer.
    y_s = _forward_streamed(w_stack, b_stack, x, tm=_pick_tm(batch), tn=128)
    y_s = jax.block_until_ready(y_s)
    assert jnp.allclose(y_s, y_ref, atol=1e-2, rtol=1e-2), float(
        jnp.max(jnp.abs(y_s - y_ref)))

    # Convenience API path.
    y_api = jax.block_until_ready(deep_forward(params, x))
    assert jnp.allclose(y_api, y_ref, atol=1e-2, rtol=1e-2)

    print("KERNEL_OK")
</pallas_src>

<mosaic_0001>
module attributes {stable_mosaic.version = 11 : i64} {
  func.func @_resident_mlp_kernel(%arg0: i32, %arg1: memref<8x256xf32, #tpu.memory_space<vmem>>, %arg2: memref<6x256x256xbf16, #tpu.memory_space<vmem>>, %arg3: memref<6x1x256xf32, #tpu.memory_space<vmem>>, %arg4: memref<8x256xf32, #tpu.memory_space<vmem>>) attributes {dimension_semantics = [#tpu.dimension_semantics<parallel>], iteration_bounds = array<i64: 2>, scalar_prefetch = 0 : i64, scratch_operands = 0 : i64, tpu.core_type = #tpu.core_type<tc>, window_params = [{transform_indices = @transform_0, window_bounds = array<i64: 8, 256>}, {pipeline_mode = #tpu.pipeline_mode<synchronous>, transform_indices = @transform_1, window_bounds = array<i64: 6, 256, 256>}, {pipeline_mode = #tpu.pipeline_mode<synchronous>, transform_indices = @transform_2, window_bounds = array<i64: 6, 1, 256>}, {transform_indices = @transform_3, window_bounds = array<i64: 8, 256>}]} {
    %c0 = arith.constant 0 : index
    %c0_0 = arith.constant 0 : index
    %0 = vector.load %arg1[%c0, %c0_0] : memref<8x256xf32, #tpu.memory_space<vmem>>, vector<8x256xf32>
    %1 = arith.truncf %0 : vector<8x256xf32> to vector<8x256xbf16>
    %c0_1 = arith.constant 0 : index
    %c0_2 = arith.constant 0 : index
    %c0_3 = arith.constant 0 : index
    %2 = vector.load %arg2[%c0_1, %c0_2, %c0_3] : memref<6x256x256xbf16, #tpu.memory_space<vmem>>, vector<1x256x256xbf16>
    %3 = vector.shape_cast %2 : vector<1x256x256xbf16> to vector<256x256xbf16>
    %cst = arith.constant dense<0.000000e+00> : vector<8x256xf32>
    %4 = tpu.matmul %1, %3, %cst {dimension_numbers = #tpu.dot_dimension_numbers<[1], [0], [0], [1], [0, 0, 1, 1], [], []>} : vector<8x256xbf16>, vector<256x256xbf16>, vector<8x256xf32> -> vector<8x256xf32>
    %c0_4 = arith.constant 0 : index
    %c0_5 = arith.constant 0 : index
    %c0_6 = arith.constant 0 : index
    %5 = vector.load %arg3[%c0_4, %c0_5, %c0_6] : memref<6x1x256xf32, #tpu.memory_space<vmem>>, vector<1x1x256xf32>
    %6 = vector.shape_cast %5 : vector<1x1x256xf32> to vector<1x256xf32>
    %7 = vector.broadcast %6 : vector<1x256xf32> to vector<8x256xf32>
    %8 = arith.addf %4, %7 : vector<8x256xf32>
    %cst_7 = arith.constant 0.000000e+00 : f32
    %9 = vector.broadcast %cst_7 : f32 to vector<8x256xf32>
    %10 = arith.maximumf %8, %9 : vector<8x256xf32>
    %11 = arith.truncf %10 : vector<8x256xf32> to vector<8x256xbf16>
    %c1 = arith.constant 1 : index
    %c0_8 = arith.constant 0 : index
    %c0_9 = arith.constant 0 : index
    %12 = vector.load %arg2[%c1, %c0_8, %c0_9] : memref<6x256x256xbf16, #tpu.memory_space<vmem>>, vector<1x256x256xbf16>
    %13 = vector.shape_cast %12 : vector<1x256x256xbf16> to vector<256x256xbf16>
    %cst_10 = arith.constant dense<0.000000e+00> : vector<8x256xf32>
    %14 = tpu.matmul %11, %13, %cst_10 {dimension_numbers = #tpu.dot_dimension_numbers<[1], [0], [0], [1], [0, 0, 1, 1], [], []>} : vector<8x256xbf16>, vector<256x256xbf16>, vector<8x256xf32> -> vector<8x256xf32>
    %c1_11 = arith.constant 1 : index
    %c0_12 = arith.constant 0 : index
    %c0_13 = arith.constant 0 : index
    %15 = vector.load %arg3[%c1_11, %c0_12, %c0_13] : memref<6x1x256xf32, #tpu.memory_space<vmem>>, vector<1x1x256xf32>
    %16 = vector.shape_cast %15 : vector<1x1x256xf32> to vector<1x256xf32>
    %17 = vector.broadcast %16 : vector<1x256xf32> to vector<8x256xf32>
    %18 = arith.addf %14, %17 : vector<8x256xf32>
    %cst_14 = arith.constant 0.000000e+00 : f32
    %19 = vector.broadcast %cst_14 : f32 to vector<8x256xf32>
    %20 = arith.maximumf %18, %19 : vector<8x256xf32>
    %21 = arith.truncf %20 : vector<8x256xf32> to vector<8x256xbf16>
    %c2 = arith.constant 2 : index
    %c0_15 = arith.constant 0 : index
    %c0_16 = arith.constant 0 : index
    %22 = vector.load %arg2[%c2, %c0_15, %c0_16] : memref<6x256x256xbf16, #tpu.memory_space<vmem>>, vector<1x256x256xbf16>
    %23 = vector.shape_cast %22 : vector<1x256x256xbf16> to vector<256x256xbf16>
    %cst_17 = arith.constant dense<0.000000e+00> : vector<8x256xf32>
    %24 = tpu.matmul %21, %23, %cst_17 {dimension_numbers = #tpu.dot_dimension_numbers<[1], [0], [0], [1], [0, 0, 1, 1], [], []>} : vector<8x256xbf16>, vector<256x256xbf16>, vector<8x256xf32> -> vector<8x256xf32>
    %c2_18 = arith.constant 2 : index
    %c0_19 = arith.constant 0 : index
    %c0_20 = arith.constant 0 : index
    %25 = vector.load %arg3[%c2_18, %c0_19, %c0_20] : memref<6x1x256xf32, #tpu.memory_space<vmem>>, vector<1x1x256xf32>
    %26 = vector.shape_cast %25 : vector<1x1x256xf32> to vector<1x256xf32>
    %27 = vector.broadcast %26 : vector<1x256xf32> to vector<8x256xf32>
    %28 = arith.addf %24, %27 : vector<8x256xf32>
    %cst_21 = arith.constant 0.000000e+00 : f32
    %29 = vector.broadcast %cst_21 : f32 to vector<8x256xf32>
    %30 = arith.maximumf %28, %29 : vector<8x256xf32>
    %31 = arith.truncf %30 : vector<8x256xf32> to vector<8x256xbf16>
    %c3 = arith.constant 3 : index
    %c0_22 = arith.constant 0 : index
    %c0_23 = arith.constant 0 : index
    %32 = vector.load %arg2[%c3, %c0_22, %c0_23] : memref<6x256x256xbf16, #tpu.memory_space<vmem>>, vector<1x256x256xbf16>
    %33 = vector.shape_cast %32 : vector<1x256x256xbf16> to vector<256x256xbf16>
    %cst_24 = arith.constant dense<0.000000e+00> : vector<8x256xf32>
    %34 = tpu.matmul %31, %33, %cst_24 {dimension_numbers = #tpu.dot_dimension_numbers<[1], [0], [0], [1], [0, 0, 1, 1], [], []>} : vector<8x256xbf16>, vector<256x256xbf16>, vector<8x256xf32> -> vector<8x256xf32>
    %c3_25 = arith.constant 3 : index
    %c0_26 = arith.constant 0 : index
    %c0_27 = arith.constant 0 : index
    %35 = vector.load %arg3[%c3_25, %c0_26, %c0_27] : memref<6x1x256xf32, #tpu.memory_space<vmem>>, vector<1x1x256xf32>
    %36 = vector.shape_cast %35 : vector<1x1x256xf32> to vector<1x256xf32>
    %37 = vector.broadcast %36 : vector<1x256xf32> to vector<8x256xf32>
    %38 = arith.addf %34, %37 : vector<8x256xf32>
    %cst_28 = arith.constant 0.000000e+00 : f32
    %39 = vector.broadcast %cst_28 : f32 to vector<8x256xf32>
    %40 = arith.maximumf %38, %39 : vector<8x256xf32>
    %41 = arith.truncf %40 : vector<8x256xf32> to vector<8x256xbf16>
    %c4 = arith.constant 4 : index
    %c0_29 = arith.constant 0 : index
    %c0_30 = arith.constant 0 : index
    %42 = vector.load %arg2[%c4, %c0_29, %c0_30] : memref<6x256x256xbf16, #tpu.memory_space<vmem>>, vector<1x256x256xbf16>
    %43 = vector.shape_cast %42 : vector<1x256x256xbf16> to vector<256x256xbf16>
    %cst_31 = arith.constant dense<0.000000e+00> : vector<8x256xf32>
    %44 = tpu.matmul %41, %43, %cst_31 {dimension_numbers = #tpu.dot_dimension_numbers<[1], [0], [0], [1], [0, 0, 1, 1], [], []>} : vector<8x256xbf16>, vector<256x256xbf16>, vector<8x256xf32> -> vector<8x256xf32>
    %c4_32 = arith.constant 4 : index
    %c0_33 = arith.constant 0 : index
    %c0_34 = arith.constant 0 : index
    %45 = vector.load %arg3[%c4_32, %c0_33, %c0_34] : memref<6x1x256xf32, #tpu.memory_space<vmem>>, vector<1x1x256xf32>
    %46 = vector.shape_cast %45 : vector<1x1x256xf32> to vector<1x256xf32>
    %47 = vector.broadcast %46 : vector<1x256xf32> to vector<8x256xf32>
    %48 = arith.addf %44, %47 : vector<8x256xf32>
    %cst_35 = arith.constant 0.000000e+00 : f32
    %49 = vector.broadcast %cst_35 : f32 to vector<8x256xf32>
    %50 = arith.maximumf %48, %49 : vector<8x256xf32>
    %51 = arith.truncf %50 : vector<8x256xf32> to vector<8x256xbf16>
    %c5 = arith.constant 5 : index
    %c0_36 = arith.constant 0 : index
    %c0_37 = arith.constant 0 : index
    %52 = vector.load %arg2[%c5, %c0_36, %c0_37] : memref<6x256x256xbf16, #tpu.memory_space<vmem>>, vector<1x256x256xbf16>
    %53 = vector.shape_cast %52 : vector<1x256x256xbf16> to vector<256x256xbf16>
    %cst_38 = arith.constant dense<0.000000e+00> : vector<8x256xf32>
    %54 = tpu.matmul %51, %53, %cst_38 {dimension_numbers = #tpu.dot_dimension_numbers<[1], [0], [0], [1], [0, 0, 1, 1], [], []>} : vector<8x256xbf16>, vector<256x256xbf16>, vector<8x256xf32> -> vector<8x256xf32>
    %c5_39 = arith.constant 5 : index
    %c0_40 = arith.constant 0 : index
    %c0_41 = arith.constant 0 : index
    %55 = vector.load %arg3[%c5_39, %c0_40, %c0_41] : memref<6x1x256xf32, #tpu.memory_space<vmem>>, vector<1x1x256xf32>
    %56 = vector.shape_cast %55 : vector<1x1x256xf32> to vector<1x256xf32>
    %57 = vector.broadcast %56 : vector<1x256xf32> to vector<8x256xf32>
    %58 = arith.addf %54, %57 : vector<8x256xf32>
    %c0_42 = arith.constant 0 : index
    %c0_43 = arith.constant 0 : index
    %59 = vector.load %arg4[%c0_42, %c0_43] : memref<8x256xf32, #tpu.memory_space<vmem>>, vector<8x256xf32>
    tpu.vector_store %arg4[%c0_42, %c0_43], %58 {strides = array<i32>} : memref<8x256xf32, #tpu.memory_space<vmem>>, vector<8x256xf32>,
    return
  }
  func.func @transform_0(%arg0: i32) -> (i32, i32) {
    %c0_i32 = arith.constant 0 : i32
    %c0_i32_0 = arith.constant 0 : i32
    return %arg0, %c0_i32 : i32, i32
  }
  func.func @transform_1(%arg0: i32) -> (i32, i32, i32) {
    %c0_i32 = arith.constant 0 : i32
    %c0_i32_0 = arith.constant 0 : i32
    %c0_i32_1 = arith.constant 0 : i32
    %c0_i32_2 = arith.constant 0 : i32
    return %c0_i32, %c0_i32_0, %c0_i32_1 : i32, i32, i32
  }
  func.func @transform_2(%arg0: i32) -> (i32, i32, i32) {
    %c0_i32 = arith.constant 0 : i32
    %c0_i32_0 = arith.constant 0 : i32
    %c0_i32_1 = arith.constant 0 : i32
    %c0_i32_2 = arith.constant 0 : i32
    return %c0_i32, %c0_i32_0, %c0_i32_1 : i32, i32, i32
  }
  func.func @transform_3(%arg0: i32) -> (i32, i32) {
    %c0_i32 = arith.constant 0 : i32
    %c0_i32_0 = arith.constant 0 : i32
    return %arg0, %c0_i32 : i32, i32
  }
}

</mosaic_0001>

<bundles_post_ra>
// kernel: deep_forward_stacked.1
= control target key start
LH: loop header
LB: loop body
LE: loop exit
PB: predicated region body
PF: predicated region fallthrough
CT: control target
= control target key end

     0   :  { %8 = vsyncpa [#allocation3], 0  ;;  %s2776_s0 = inlined_call_operand.hbm [shape: f32[16,256], index: 0, kind: input, shape index: {}]   ;;  %s2777_s1 = inlined_call_operand.hbm [shape: bf16[6,256,256], index: 1, kind: input, shape index: {}]   ;;  %s2778_s2 = inlined_call_operand.hbm [shape: f32[6,1,256], index: 2, kind: input, shape index: {}]   ;;  %s2779_s3 = inlined_call_operand.hbm [shape: f32[16,256], index: 3, kind: output, shape index: {}]  }
   0x1   :  { %10 = vsyncpa [#allocation3 + $0x1], 0 }
   0x2   :  { %11 = vsyncpa [#allocation6], 0 }
   0x3   :  { %12 = vsyncpa [#allocation4], 0 }
   0x4   :  { %14 = vsyncpa [#allocation4 + $0x1], 0  ;;  %s2575_s12 = smov 0   ;;  %s2577_s13 = smov 0  }
   0x5   :  { %s2579_s14 = smov 0   ;;  %s2581_s15 = smov 0  }
   0x6 LB: > { %s2596_s16 = sadd.s32 4294967295, %s2545_s15   ;;  %s1826_s17 = sadd.s32 4294967294, %s2545_s15   ;;  %s2545_s15 = sphi %s2581_s15, %s2801_s15   ;;  %s2541_s14 = sphi %s2579_s14, %s2800_s14   ;;  %s2537_s13 = sphi %s2577_s13, %s2799_s13   ;;  %s2533_s12 = sphi %s2575_s12, %s2798_s12  }
   0x7   : > { %p40_p0 = scmp.ne.s32.totalorder %s2537_s13, %s2533_s12  ;;  %p2780_p1 = scmp.eq.s32.totalorder %s2596_s16, 0 }
   0x8   : > { %p112_p3 = scmp.eq.s32.totalorder %s1826_s17, 1  ;;  %p1827_p5 = scmp.ge.s32.totalorder %s2545_s15, 1 }
   0x9   : > { %p2605_p4 = por %p2780_p1, %p40_p0  ;;  %p119_p7 = scmp.lt.s32.totalorder %s2545_s15, 3 }
   0xa   : > { %p2610_p6 = por %p112_p3, %p40_p0  ;;  %s2547_s21 = smov [#allocation5]  }
   0xb   : > { %s2784_s18 = scalar_select %p2605_p4, 1, 0 }
   0xc   : > { %s2785_s19 = scalar_select %p2610_p6, 1, 0 }
   0xd   : > { %p2615_p8 = pnand %p1827_p5, %p119_p7  ;;  %s131_s22 = sshll.u32 %s2547_s21, 4  ;;  %s132_s22 = int_to_ptr.vmem [resolvable:$true] %s131_s22 }
   0xe   : > { %s2548_s24 = smov [#allocation7]   ;;  %s2408_s26 = scalar_lea.vmem %s132_s22, 24576 }
   0xf   : > { %s2786_s20 = scalar_select %p2615_p8, 1, 0 }
  0x10   : > { %p2050_p9 = pneg %p2615_p8  ;;  %s144_s25 = sshll.u32 %s2548_s24, 4  ;;  %s145_s25 = int_to_ptr.vmem [resolvable:$true] %s144_s25 }
  0x11   : > { %p2409_p13 = scmp.ne.s32.totalorder %s132_s22, %s2408_s26  ;;  %p2416_p5 = scmp.lt.s32.totalorder %s132_s22, %s132_s22 }
  0x12   : > { %p2624_p11 = pnand %p2050_p9, %p2780_p1  ;;  %p2417_p7 = scmp.lt.s32.totalorder %s2408_s26, %s2408_s26 }
  0x14   : > { %p2399_p12 = pneg %p2624_p11  ;;  %p2418_p10 = por %p2417_p7, %p2416_p5 }
  0x16   : > { %p2411_p0 = pnand %p2409_p13, %p2399_p12 }
  0x18   : > { %p2412_p3 = pneg %p2411_p0 }
  0x1a   : > { %p2419_p9 = pnand %p2418_p10, %p2412_p3 }
  0x1c   : > { %2422 = shalt.err (!%p2419_p9)
}
  0x1d   : > { %s2549_s27 = smov 128   ;;  %s2550_s28 = smov 8  }
  0x1e   : > { %2053 = dma.hbm_to_vmem [thread:$0]  (!%p2624_p11), %s2777_s1, 24576, %s132_s22, [#allocation6], %s2549_s27, %s2549_s27, %s2550_s28  }
  0x1f   : > { %s2434_s4 = scalar_lea.vmem %s145_s25, 192  ;;  %p2442_p2 = scmp.lt.s32.totalorder %s145_s25, %s145_s25 }
  0x20   : > { %p2435_p1 = scmp.ne.s32.totalorder %s145_s25, %s2434_s4  ;;  %p2443_p6 = scmp.lt.s32.totalorder %s2434_s4, %s2434_s4 }
  0x22   : > { %p2437_p13 = pnand %p2435_p1, %p2399_p12  ;;  %p2444_p5 = por %p2443_p6, %p2442_p2 }
  0x24   : > { %p2438_p0 = pneg %p2437_p13 }
  0x26   : > { %p2445_p10 = pnand %p2444_p5, %p2438_p0 }
  0x28   : > { %2448 = shalt.err (!%p2445_p10)
}
  0x29   : > { %s2551_s5 = smov 32   ;;  %s2552_s6 = smov 2  }
  0x2a   : > { %2056 = dma.hbm_to_vmem [thread:$0]  (!%p2624_p11), %s2778_s2, 192, %s145_s25, [#allocation6], %s2551_s5, %s2551_s5, %s2552_s6  }
  0x2b   : > { %s2647_s9 = sadd.s32 1, %s2545_s15   ;;  %s27_s11 = sadd.s32 1, %s2541_s14 }
  0x2c   : > { %s24_s10 = ssub.s32 %s2545_s15, %s2647_s9  ;;  %p34_p2 = scmp.ne.s32.totalorder %s2541_s14, %s2537_s13 }
  0x2d   : > { %p25_p1 = scmp.eq.s32.totalorder %s24_s10, 0  ;;  %p35_p6 = scmp.eq.s32.totalorder %s2545_s15, 0 }
  0x2e   : > { %p2788_p3 = scmp.eq.s32.totalorder %s2596_s16, 1  ;;  %p2067_p9 = scmp.lt.s32.totalorder %s2545_s15, 2 }
  0x2f   : > { %s2656_s17 = scalar_select %p25_p1, %s2541_s14, %s27_s11  }
  0x30   : > { %p36_p12 = por %p35_p6, %p34_p2  ;;  %p2660_p7 = por %p2788_p3, %p34_p2 }
  0x31   : > { %s158_s22 = sand.u32 1, %s2541_s14   ;;  %s2036_s24 = sshll.u32 %s2545_s15, 8 }
  0x32   : > { %s2789_s21 = scalar_select %p2660_p7, 1, 0 }
  0x33   : > { %s1831_s23 = sshll.u32 %s158_s22, 4  ;;  %s2670_s27 = scalar_lea.hbm %s2776_s0, %s2036_s24 }
  0x34   : > { %s162_s28 = scalar_lea.vmem [#allocation2], %s1831_s23  ;;  %p2672_p11 = pnand %p2067_p9, %p36_p12 }
  0x35   : > { %s170_s29 = sshll.u32 %s162_s28, 4  ;;  %s159_s4 = scalar_lea.sflag [#allocation3], %s158_s22  ;;  %s171_s29 = int_to_ptr.vmem [resolvable:$true] %s170_s29 }
  0x36   : > { %s2449_s5 = scalar_lea.hbm %s2670_s27, 256  ;;  %p2451_p0 = pneg %p2672_p11 }
  0x37   : > { %p2450_p13 = scmp.ne.s32.totalorder %s2670_s27, %s2449_s5  ;;  %s2454_s8 = scalar_lea.hbm %s2776_s0, 512 }
  0x38   : > { %p2455_p1 = scmp.lt.s32.totalorder %s2670_s27, %s2776_s0  ;;  %p2456_p2 = scmp.lt.s32.totalorder %s2454_s8, %s2449_s5 }
  0x39   : > { %p2452_p5 = pnand %p2451_p0, %p2450_p13 }
  0x3a   : > { %p2457_p6 = por %p2456_p2, %p2455_p1 }
  0x3b   : > { %p2453_p10 = pneg %p2452_p5 }
  0x3d   : > { %p2458_p12 = pnand %p2457_p6, %p2453_p10 }
  0x3f   : > { %2461 = shalt.err (!%p2458_p12)
}
  0x40   : > { %s2462_s23 = scalar_lea.vmem %s171_s29, 256  ;;  %s2553_s22 = smov [#allocation2]  }
  0x41   : > { %p2463_p3 = scmp.ne.s32.totalorder %s171_s29, %s2462_s23  ;;  %s2467_s24 = sshll.u32 %s2553_s22, 4  ;;  %s2468_s24 = int_to_ptr.vmem [resolvable:$false] %s2467_s24 }
  0x42   : > { %s2469_s25 = scalar_lea.vmem %s2468_s24, 512  ;;  %p2470_p13 = scmp.lt.s32.totalorder %s171_s29, %s2468_s24 }
  0x43   : > { %p2465_p9 = pnand %p2463_p3, %p2451_p0  ;;  %p2471_p5 = scmp.lt.s32.totalorder %s2469_s25, %s2462_s23 }
  0x45   : > { %p2466_p7 = pneg %p2465_p9  ;;  %p2472_p4 = por %p2471_p5, %p2470_p13 }
  0x47   : > { %p2473_p8 = pnand %p2472_p4, %p2466_p7 }
  0x49   : > { %2476 = shalt.err (!%p2473_p8)
}
  0x4a   : > { %2060 = dma.hbm_to_vmem [thread:$0]  (!%p2672_p11), %s2670_s27, 256, %s171_s29, %s159_s4  }
  0x4b   : > { %p2791_p10 = scmp.ne.s32.totalorder %s2786_s20, 0 }
  0x4c   : > { %s2693_s26 = sand.u32 (!%p2791_p10), 1, %s2537_s13   ;;  %p2792_p4 = scmp.ne.s32.totalorder (!%p2791_p10), %s2784_s18, 0 }
  0x4d   : > { %179 = sbr.rel (%p2791_p10) target bundleno = 1372 (0x55c), region = 32  ;;  %s1835_s28 = sshll.u32 (!%p2791_p10), %s2693_s26, 4 }
  0x4e   : > { %s182_s5 = scalar_lea.sflag (!%p2791_p10), [#allocation3], %s2693_s26  ;;  %s2699_s6 = scalar_lea.vmem (!%p2791_p10), [#allocation2], %s1835_s28 }
  0x52   : > { %2520 = dma.done.wait (%p2792_p4), %s182_s5, 256  }
  0x53   : > { %2522 = vsyncadd (%p2792_p4), %s182_s5, 4294967040  ;;  %p2793_p8 = scmp.eq.s32.totalorder %s2596_s16, 0 }
  0x55   : > { %2524 = dma.done.wait (%p2793_p8), [#allocation6], 24768   ;;  %p2794_p7 = pmov %p2793_p8 }
  0x56   : > { %v2109_v0 = vld [vmem:[#allocation5 + $0x74] ss:$8 sps:$4 sm:$0xff]   ;;  %v2111_v1 = vld [vmem:[#allocation5 + $0x70] ss:$8 sps:$4 sm:$0xff]   ;;  %v2112_v2 = vld [vmem:[#allocation5 + $0x64] ss:$8 sps:$4 sm:$0xff]  }
  0x57   : > { %2526 = vsyncadd (%p2794_p7), [#allocation6], 4294942528  ;;  %424 = vmatprep.subr.bf16.mxu0 %v2109_v0  ;;  %v2114_v3 = vld [vmem:[#allocation5 + $0x60] ss:$8 sps:$4 sm:$0xff]   ;;  %v2115_v4 = vld [vmem:[#allocation5 + $0x54] ss:$8 sps:$4 sm:$0xff]  }
  0x58   : > { %425 = vmatpush1.bf16.msra.mxu0 %v2111_v1  ;;  %v2117_v5 = vld [vmem:[#allocation5 + $0x50] ss:$8 sps:$4 sm:$0xff]   ;;  %v2118_v6 = vld [vmem:[#allocation5 + $0x44] ss:$8 sps:$4 sm:$0xff]   ;;  %v2120_v7 = vld [vmem:[#allocation5 + $0x40] ss:$8 sps:$4 sm:$0xff]  }
  0x59   : > { %426 = vmatprep.subr.bf16.mxu0 %v2112_v2  ;;  %v2121_v8 = vld [vmem:[#allocation5 + $0x34] ss:$8 sps:$4 sm:$0xff]   ;;  %v2123_v9 = vld [vmem:[#allocation5 + $0x30] ss:$8 sps:$4 sm:$0xff]   ;;  %v2124_v10 = vld [vmem:[#allocation5 + $0x24] ss:$8 sps:$4 sm:$0xff]  }
  0x5a   : > { %v2126_v11 = vld [vmem:[#allocation5 + $0x20] ss:$8 sps:$4 sm:$0xff]   ;;  %v2127_v12 = vld [vmem:[#allocation5 + $0x14] ss:$8 sps:$4 sm:$0xff]   ;;  %v2129_v13 = vld [vmem:[#allocation5 + $0x10] ss:$8 sps:$4 sm:$0xff]  }
  0x5b   : > { %v217_v14 = vld [vmem:[%s2699_s6 + $0x8] sm:$0xff]  ;;  %v216_v54 = vld [vmem:[%s2699_s6] sm:$0xff]  ;;  %s2037_s18 = sshll.u32 %s2596_s16, 8  ;;  %s215_s20 = scalar_lea.vmem [#allocation8], %s1835_s28 }
  0x5c   : > { %427 = vmatpush1.bf16.msra.mxu0 %v2114_v3  ;;  %v219_v15 = vpack.c.bf16 %v217_v14, %v217_v14  ;;  %v2157_v16 = vld [vmem:[#allocation5 + $0x174] ss:$8 sps:$4 sm:$0xff]   ;;  %v2159_v17 = vld [vmem:[#allocation5 + $0x170] ss:$8 sps:$4 sm:$0xff]   ;;  %v2130_v18 = vld [vmem:[#allocation5 + $0x4] ss:$8 sps:$4 sm:$0xff]   ;;  %v218_v58 = vpack.c.bf16 %v216_v54, %v216_v54  ;;  %s2733_s4 = scalar_lea.hbm %s2779_s3, %s2037_s18 }
  0x5d   : > { %428 = vmatprep.subr.bf16.mxu0 %v2115_v4  ;;  %v2160_v19 = vld [vmem:[#allocation5 + $0x164] ss:$8 sps:$4 sm:$0xff]   ;;  %v2132_v20 = vld [vmem:[#allocation5] ss:$8 sps:$4 sm:$0xff]   ;;  %675 = vmatprep.subr.bf16.mxu1 %v2157_v16  ;;  %v2163_v22 = vld [vmem:[#allocation5 + $0x154] ss:$8 sps:$4 sm:$0xff]  }
  0x5e   : > { %456 = vmatprep.mubr.bf16.mxu0 %v219_v15  ;;  %676 = vmatpush1.bf16.msra.mxu1 %v2159_v17  ;;  %v2162_v21 = vld [vmem:[#allocation5 + $0x160] ss:$8 sps:$4 sm:$0xff]   ;;  %v2133_v23 = vld [vmem:[#allocation5 + $0xf4] ss:$8 sps:$4 sm:$0xff]   ;;  %v2135_v24 = vld [vmem:[#allocation5 + $0xf0] ss:$8 sps:$4 sm:$0xff]  }
  0x5f   : > { %677 = vmatprep.subr.bf16.mxu1 %v2160_v19  ;;  %v2165_v25 = vld [vmem:[#allocation5 + $0x150] ss:$8 sps:$4 sm:$0xff]   ;;  %v2166_v26 = vld [vmem:[#allocation5 + $0x144] ss:$8 sps:$4 sm:$0xff]   ;;  %v2138_v28 = vld [vmem:[#allocation5 + $0xe0] ss:$8 sps:$4 sm:$0xff]  }
  0x60   : > { %429 = vmatpush1.bf16.msra.mxu0 %v2117_v5  ;;  %v2136_v27 = vld [vmem:[#allocation5 + $0xe4] ss:$8 sps:$4 sm:$0xff]   ;;  %v2168_v29 = vld [vmem:[#allocation5 + $0x140] ss:$8 sps:$4 sm:$0xff]   ;;  %v2169_v30 = vld [vmem:[#allocation5 + $0x134] ss:$8 sps:$4 sm:$0xff]  }
  0x61   : > { %430 = vmatprep.subr.bf16.mxu0 %v2118_v6  ;;  %v2139_v31 = vld [vmem:[#allocation5 + $0xd4] ss:$8 sps:$4 sm:$0xff]   ;;  %v2141_v32 = vld [vmem:[#allocation5 + $0xd0] ss:$8 sps:$4 sm:$0xff]   ;;  %v2172_v34 = vld [vmem:[#allocation5 + $0x124] ss:$8 sps:$4 sm:$0xff]  }
  0x62   : > { %678 = vmatpush1.bf16.msra.mxu1 %v2162_v21  ;;  %v2171_v33 = vld [vmem:[#allocation5 + $0x130] ss:$8 sps:$4 sm:$0xff]   ;;  %v2142_v35 = vld [vmem:[#allocation5 + $0xc4] ss:$8 sps:$4 sm:$0xff]   ;;  %v2174_v36 = vld [vmem:[#allocation5 + $0x120] ss:$8 sps:$4 sm:$0xff]  }
  0x63   : > { %679 = vmatprep.subr.bf16.mxu1 %v2163_v22  ;;  %v2144_v37 = vld [vmem:[#allocation5 + $0xc0] ss:$8 sps:$4 sm:$0xff]   ;;  %v2175_v38 = vld [vmem:[#allocation5 + $0x114] ss:$8 sps:$4 sm:$0xff]   ;;  %v2177_v40 = vld [vmem:[#allocation5 + $0x110] ss:$8 sps:$4 sm:$0xff]  }
  0x64   : > { %431 = vmatpush1.bf16.msra.mxu0 %v2120_v7  ;;  %v2145_v39 = vld [vmem:[#allocation5 + $0xb4] ss:$8 sps:$4 sm:$0xff]   ;;  %v2147_v41 = vld [vmem:[#allocation5 + $0xb0] ss:$8 sps:$4 sm:$0xff]   ;;  %v2178_v42 = vld [vmem:[#allocation5 + $0x104] ss:$8 sps:$4 sm:$0xff]  }
  0x65   : > { %432 = vmatprep.subr.bf16.mxu0 %v2121_v8  ;;  %v2148_v43 = vld [vmem:[#allocation5 + $0xa4] ss:$8 sps:$4 sm:$0xff]   ;;  %v2180_v44 = vld [vmem:[#allocation5 + $0x100] ss:$8 sps:$4 sm:$0xff]   ;;  %v2181_v46 = vld [vmem:[#allocation5 + $0x1f4] ss:$8 sps:$4 sm:$0xff]  }
  0x66   : > { %680 = vmatpush1.bf16.msra.mxu1 %v2165_v25  ;;  %v2150_v45 = vld [vmem:[#allocation5 + $0xa0] ss:$8 sps:$4 sm:$0xff]   ;;  %v2151_v47 = vld [vmem:[#allocation5 + $0x94] ss:$8 sps:$4 sm:$0xff]   ;;  %v2183_v48 = vld [vmem:[#allocation5 + $0x1f0] ss:$8 sps:$4 sm:$0xff]  }
  0x67   : > { %681 = vmatprep.subr.bf16.mxu1 %v2166_v26  ;;  %v2153_v49 = vld [vmem:[#allocation5 + $0x90] ss:$8 sps:$4 sm:$0xff]   ;;  %v2184_v50 = vld [vmem:[#allocation5 + $0x1e4] ss:$8 sps:$4 sm:$0xff]   ;;  %v2186_v52 = vld [vmem:[#allocation5 + $0x1e0] ss:$8 sps:$4 sm:$0xff]  }
  0x68   : > { %433 = vmatpush1.bf16.msra.mxu0 %v2123_v9  ;;  %v2154_v51 = vld [vmem:[#allocation5 + $0x84] ss:$8 sps:$4 sm:$0xff]   ;;  %v2156_v53 = vld [vmem:[#allocation5 + $0x80] ss:$8 sps:$4 sm:$0xff]   ;;  %v2187_v55 = vld [vmem:[#allocation5 + $0x1d4] ss:$8 sps:$4 sm:$0xff]  }
  0x69   : > { %434 = vmatprep.subr.bf16.mxu0 %v2124_v10  ;;  %v2189_v56 = vld [vmem:[#allocation5 + $0x1d0] ss:$8 sps:$4 sm:$0xff]   ;;  %v2190_v57 = vld [vmem:[#allocation5 + $0x1c4] ss:$8 sps:$4 sm:$0xff]   ;;  %v2192_v59 = vld [vmem:[#allocation5 + $0x1c0] ss:$8 sps:$4 sm:$0xff]  }
  0x6a   : > { %682 = vmatpush1.bf16.msra.mxu1 %v2168_v29  ;;  %v2193_v60 = vld [vmem:[#allocation5 + $0x1b4] ss:$8 sps:$4 sm:$0xff]   ;;  %v2195_v61 = vld [vmem:[#allocation5 + $0x1b0] ss:$8 sps:$4 sm:$0xff]   ;;  %v2196_v62 = vld [vmem:[#allocation5 + $0x1a4] ss:$8 sps:$4 sm:$0xff]  }
  0x6b   : > { %683 = vmatprep.subr.bf16.mxu1 %v2169_v30  ;;  %v2198_v63 = vld [vmem:[#allocation5 + $0x1a0] ss:$8 sps:$4 sm:$0xff]   ;;  %v2199_v0 = vld [vmem:[#allocation5 + $0x194] ss:$8 sps:$4 sm:$0xff]   ;;  %v2201_v1 = vld [vmem:[#allocation5 + $0x190] ss:$8 sps:$4 sm:$0xff]  }
  0x6c   : > { %435 = vmatpush1.bf16.msra.mxu0 %v2126_v11  ;;  %v2202_v2 = vld [vmem:[#allocation5 + $0x184] ss:$8 sps:$4 sm:$0xff]   ;;  %v2204_v3 = vld [vmem:[#allocation5 + $0x180] ss:$8 sps:$4 sm:$0xff]   ;;  %v2205_v4 = vld [vmem:[#allocation5 + $0x270] ss:$8 sps:$4 sm:$0xff]  }
  0x6d   : > { %436 = vmatprep.subr.bf16.mxu0 %v2127_v12  ;;  %v2207_v5 = vld [vmem:[#allocation5 + $0x274] ss:$8 sps:$4 sm:$0xff]   ;;  %v2210_v6 = vld [vmem:[#allocation5 + $0x264] ss:$8 sps:$4 sm:$0xff]   ;;  %v2208_v7 = vld [vmem:[#allocation5 + $0x260] ss:$8 sps:$4 sm:$0xff]  }
  0x6e   : > { %684 = vmatpush1.bf16.msra.mxu1 %v2171_v33  ;;  %v2213_v8 = vld [vmem:[#allocation5 + $0x254] ss:$8 sps:$4 sm:$0xff]   ;;  %v2211_v9 = vld [vmem:[#allocation5 + $0x250] ss:$8 sps:$4 sm:$0xff]   ;;  %v2216_v10 = vld [vmem:[#allocation5 + $0x244] ss:$8 sps:$4 sm:$0xff]  }
  0x6f   : > { %685 = vmatprep.subr.bf16.mxu1 %v2172_v34  ;;  %v2214_v11 = vld [vmem:[#allocation5 + $0x240] ss:$8 sps:$4 sm:$0xff]   ;;  %v2219_v12 = vld [vmem:[#allocation5 + $0x234] ss:$8 sps:$4 sm:$0xff]   ;;  %v2222_v14 = vld [vmem:[#allocation5 + $0x224] ss:$8 sps:$4 sm:$0xff]  }
  0x70   : > { %437 = vmatpush1.bf16.msra.mxu0 %v2129_v13  ;;  %v2217_v13 = vld [vmem:[#allocation5 + $0x230] ss:$8 sps:$4 sm:$0xff]   ;;  %v2220_v15 = vld [vmem:[#allocation5 + $0x220] ss:$8 sps:$4 sm:$0xff]   ;;  %v2225_v16 = vld [vmem:[#allocation5 + $0x214] ss:$8 sps:$4 sm:$0xff]  }
  0x71   : > { %438 = vmatprep.subr.bf16.mxu0 %v2130_v18  ;;  %v2223_v17 = vld [vmem:[#allocation5 + $0x210] ss:$8 sps:$4 sm:$0xff]   ;;  %v2228_v18 = vld [vmem:[#allocation5 + $0x204] ss:$8 sps:$4 sm:$0xff]   ;;  %v2226_v19 = vld [vmem:[#allocation5 + $0x200] ss:$8 sps:$4 sm:$0xff]  }
  0x72   : > { %686 = vmatpush1.bf16.msra.mxu1 %v2174_v36  ;;  %v2229_v21 = vld [vmem:[#allocation5 + $0x2f0] ss:$8 sps:$4 sm:$0xff]   ;;  %v2234_v22 = vld [vmem:[#allocation5 + $0x2e4] ss:$8 sps:$4 sm:$0xff]   ;;  %v2255_v54 = vld [vmem:[#allocation5 + $0x374] ss:$8 sps:$4 sm:$0xff]  }
  0x73   : > { %687 = vmatprep.subr.bf16.mxu1 %v2175_v38  ;;  %v2235_v25 = vld [vmem:[#allocation5 + $0x2d0] ss:$8 sps:$4 sm:$0xff]   ;;  %v2240_v26 = vld [vmem:[#allocation5 + $0x2c4] ss:$8 sps:$4 sm:$0xff]   ;;  %s1737_s27 = sshll.u32 %s215_s20, 4  ;;  %s1723_s16 = scalar_lea.sflag [#allocation4], %s2693_s26  ;;  %s2735_s27 = int_to_ptr.vmem [resolvable:$true] %s1737_s27 }
  0x74   : > { %439 = vmatpush1.bf16.msra.mxu0 %v2132_v20  ;;  %v2231_v20 = vld [vmem:[#allocation5 + $0x2f4] ss:$8 sps:$4 sm:$0xff]   ;;  %v2241_v29 = vld [vmem:[#allocation5 + $0x2b0] ss:$8 sps:$4 sm:$0xff]   ;;  %v2246_v30 = vld [vmem:[#allocation5 + $0x2a4] ss:$8 sps:$4 sm:$0xff]  }
  0x75   : > { %440 = vmatprep.subr.bf16.mxu0 %v2133_v23  ;;  %v2232_v23 = vld [vmem:[#allocation5 + $0x2e0] ss:$8 sps:$4 sm:$0xff]   ;;  %s2477_s7 = scalar_lea.vmem %s2735_s27, 256  ;;  %p2795_p0 = scmp.ne.s32.totalorder %s2789_s21, 0 }
  0x76   : > { %688 = vmatpush1.bf16.msra.mxu1 %v2177_v40  ;;  %p2478_p11 = scmp.ne.s32.totalorder %s2735_s27, %s2477_s7  ;;  %s2554_s8 = smov [#allocation8]  }
  0x77   : > { %689 = vmatprep.subr.bf16.mxu1 %v2178_v42  ;;  %s2481_s10 = sshll.u32 %s2554_s8, 4  ;;  %s2482_s10 = int_to_ptr.vmem [resolvable:$false] %s2481_s10 }
  0x78   : > { %441 = vmatpush2.bf16.msra.mxu0 %v2135_v24  ;;  %v2237_v24 = vld [vmem:[#allocation5 + $0x2d4] ss:$8 sps:$4 sm:$0xff]   ;;  %p2479_p1 = pnand %p2478_p11, %p2795_p0  ;;  %s2483_s11 = scalar_lea.vmem %s2482_s10, 512 }
  0x79   : > { %442 = vmatprep.subr.bf16.mxu0 %v2136_v27  ;;  %v2238_v27 = vld [vmem:[#allocation5 + $0x2c0] ss:$8 sps:$4 sm:$0xff]   ;;  %p2484_p6 = scmp.lt.s32.totalorder %s2735_s27, %s2482_s10  ;;  %p2485_p12 = scmp.lt.s32.totalorder %s2483_s11, %s2477_s7 }
  0x7a   : > { %690 = vmatpush1.bf16.msra.mxu1 %v2180_v44  ;;  %p2480_p2 = pneg %p2479_p1 }
  0x7b   : > { %691 = vmatprep.subr.bf16.mxu1 %v2181_v46  ;;  %p2486_p3 = por %p2485_p12, %p2484_p6 }
  0x7c   : > { %443 = vmatpush2.bf16.msra.mxu0 %v2138_v28  ;;  %v2243_v28 = vld [vmem:[#allocation5 + $0x2b4] ss:$8 sps:$4 sm:$0xff]  }
  0x7d   : > { %444 = vmatprep.subr.bf16.mxu0 %v2139_v31  ;;  %v2244_v31 = vld [vmem:[#allocation5 + $0x2a0] ss:$8 sps:$4 sm:$0xff]   ;;  %p2487_p9 = pnand %p2486_p3, %p2480_p2 }
  0x7e   : > { %692 = vmatpush2.bf16.msra.mxu1 %v2183_v48 }
  0x7f   : > { %693 = vmatprep.subr.bf16.mxu1 %v2184_v50  ;;  %v2247_v50 = vld [vmem:[#allocation5 + $0x290] ss:$8 sps:$4 sm:$0xff]  }
  0x80   : > { %445 = vmatpush2.bf16.msra.mxu0 %v2141_v32  ;;  %v254_v32 = vlaneseq }
  0x81   : > { %446 = vmatprep.subr.bf16.mxu0 %v2142_v35  ;;  %v252_v35 = vld [vmem:[#allocation7] sm:$0x3] }
  0x82   : > { %694 = vmatpush2.bf16.msra.mxu1 %v2186_v52  ;;  %v255_v33 = vshrl.u32 %v254_v32, 7  ;;  %v2250_v52 = vld [vmem:[#allocation5 + $0x280] ss:$8 sps:$4 sm:$0xff]   ;;  %v2300_v32 = vld [vmem:[#allocation5 + $0x384] ss:$8 sps:$4 sm:$0xff]  }
  0x83   : > { %695 = vmatprep.subr.bf16.mxu1 %v2187_v55  ;;  %v2258_v55 = vld [vmem:[#allocation5 + $0x364] ss:$8 sps:$4 sm:$0xff]  }
  0x84   : > { %447 = vmatpush2.bf16.msra.mxu0 %v2144_v37  ;;  %v2711_v34 = vsub.s32 0, %v255_v33  ;;  %v2713_v36 = vsub.s32 1, %v255_v33  ;;  %v2298_v33 = vld [vmem:[#allocation5 + $0x380] ss:$8 sps:$4 sm:$0xff]  }
  0x85   : > { %448 = vmatprep.subr.bf16.mxu0 %v2145_v39 }
  0x86   : > { %696 = vmatpush2.bf16.msra.mxu1 %v2189_v56  ;;  %v257_v37 = vrot.slane %v252_v35, %v2711_v34  ;;  %v261_v38 = vrot.slane %v252_v35, %v2713_v36  ;;  %v2256_v56 = vld [vmem:[#allocation5 + $0x360] ss:$8 sps:$4 sm:$0xff]   ;;  %v2301_v35 = vld [vmem:[#allocation5 + $0x470] ss:$8 sps:$4 sm:$0xff]  }
  0x87   : > { %697 = vmatprep.subr.bf16.mxu1 %v2190_v57  ;;  %v2261_v57 = vld [vmem:[#allocation5 + $0x354] ss:$8 sps:$4 sm:$0xff]  }
  0x88   : > { %449 = vmatpush2.bf16.msra.mxu0 %v2147_v41 }
  0x89   : > { %450 = vmatprep.subr.bf16.mxu0 %v2148_v43 }
  0x8a   : > { %698 = vmatpush2.bf16.msra.mxu1 %v2192_v59  ;;  %v2264_v59 = vld [vmem:[#allocation5 + $0x344] ss:$8 sps:$4 sm:$0xff]  }
  0x8b   : > { %699 = vmatprep.subr.bf16.mxu1 %v2193_v60  ;;  %v2262_v60 = vld [vmem:[#allocation5 + $0x340] ss:$8 sps:$4 sm:$0xff]  }
  0x8c   : > { %451 = vmatpush2.bf16.msra.mxu0 %v2150_v45 }
  0x8d   : > { %452 = vmatprep.subr.bf16.mxu0 %v2151_v47 }
  0x8e   : > { %700 = vmatpush2.bf16.msra.mxu1 %v2195_v61  ;;  %v2267_v61 = vld [vmem:[#allocation5 + $0x334] ss:$8 sps:$4 sm:$0xff]  }
  0x8f   : > { %701 = vmatprep.subr.bf16.mxu1 %v2196_v62  ;;  %v2265_v62 = vld [vmem:[#allocation5 + $0x330] ss:$8 sps:$4 sm:$0xff]  }
  0x90   : > { %453 = vmatpush2.bf16.msra.mxu0 %v2153_v49  ;;  %v2249_v49 = vld [vmem:[#allocation5 + $0x294] ss:$8 sps:$4 sm:$0xff]  }
  0x91   : > { %454 = vmatprep.subr.bf16.mxu0 %v2154_v51  ;;  %v2252_v51 = vld [vmem:[#allocation5 + $0x284] ss:$8 sps:$4 sm:$0xff]  }
  0x92   : > { %702 = vmatpush2.bf16.msra.mxu1 %v2198_v63  ;;  %v2270_v63 = vld [vmem:[#allocation5 + $0x324] ss:$8 sps:$4 sm:$0xff]  }
  0x93   : > { %703 = vmatprep.subr.bf16.mxu1 %v2199_v0  ;;  %v2268_v0 = vld [vmem:[#allocation5 + $0x320] ss:$8 sps:$4 sm:$0xff]  }
  0x94   : > { %455 = vmatpush2.bf16.msra.mxu0 %v2156_v53  ;;  %v2253_v53 = vld [vmem:[#allocation5 + $0x370] ss:$8 sps:$4 sm:$0xff]  }
  0x95   : > { %926 = vmatprep.subr.bf16.mxu0 %v2207_v5  ;;  %v2279_v5 = vld [vmem:[#allocation5 + $0x3f4] ss:$8 sps:$4 sm:$0xff]  }
  0x96   : > { %704 = vmatpush2.bf16.msra.mxu1 %v2201_v1  ;;  %v2273_v1 = vld [vmem:[#allocation5 + $0x314] ss:$8 sps:$4 sm:$0xff]  }
  0x97   : > { %457 = vmatmul.mubr.bf16.vlgmr.msra.gmra.mxu0 %v218_v58  ;;  %705 = vmatprep.subr.bf16.mxu1 %v2202_v2  ;;  %v2259_v58 = vld [vmem:[#allocation5 + $0x350] ss:$8 sps:$4 sm:$0xff]  }
  0x98   : > { %927 = vmatpush1.bf16.msra.mxu0 %v2205_v4  ;;  %v2271_v2 = vld [vmem:[#allocation5 + $0x310] ss:$8 sps:$4 sm:$0xff]   ;;  %v2274_v4 = vld [vmem:[#allocation5 + $0x300] ss:$8 sps:$4 sm:$0xff]  }
  0x99   : > { %928 = vmatprep.subr.bf16.mxu0 %v2210_v6  ;;  %v2277_v6 = vld [vmem:[#allocation5 + $0x3f0] ss:$8 sps:$4 sm:$0xff]  }
  0x9a   : > { %706 = vmatpush2.bf16.msra.mxu1 %v2204_v3  ;;  %v2276_v3 = vld [vmem:[#allocation5 + $0x304] ss:$8 sps:$4 sm:$0xff]  }
  0x9b   : > { %1177 = vmatprep.subr.bf16.mxu1 %v2255_v54  ;;  %v2330_v54 = vld [vmem:[#allocation5 + $0x4e4] ss:$8 sps:$4 sm:$0xff]  }
  0x9c   : > { %929 = vmatpush1.bf16.msra.mxu0 %v2208_v7  ;;  %v2282_v7 = vld [vmem:[#allocation5 + $0x3e4] ss:$8 sps:$4 sm:$0xff]  }
  0x9d   : > { %930 = vmatprep.subr.bf16.mxu0 %v2213_v8  ;;  %v2280_v8 = vld [vmem:[#allocation5 + $0x3e0] ss:$8 sps:$4 sm:$0xff]  }
  0xa0   : > { %931 = vmatpush1.bf16.msra.mxu0 %v2211_v9  ;;  %v2285_v9 = vld [vmem:[#allocation5 + $0x3d4] ss:$8 sps:$4 sm:$0xff]  }
  0xa1   : > { %932 = vmatprep.subr.bf16.mxu0 %v2216_v10  ;;  %v2283_v10 = vld [vmem:[#allocation5 + $0x3d0] ss:$8 sps:$4 sm:$0xff]  }
  0xa4   : > { %933 = vmatpush1.bf16.msra.mxu0 %v2214_v11  ;;  %v2288_v11 = vld [vmem:[#allocation5 + $0x3c4] ss:$8 sps:$4 sm:$0xff]  }
  0xa5   : > { %934 = vmatprep.subr.bf16.mxu0 %v2219_v12  ;;  %v2286_v12 = vld [vmem:[#allocation5 + $0x3c0] ss:$8 sps:$4 sm:$0xff]  }
  0xa8   : > { %935 = vmatpush1.bf16.msra.mxu0 %v2217_v13  ;;  %v2291_v13 = vld [vmem:[#allocation5 + $0x3b4] ss:$8 sps:$4 sm:$0xff]  }
  0xa9   : > { %936 = vmatprep.subr.bf16.mxu0 %v2222_v14  ;;  %v2289_v14 = vld [vmem:[#allocation5 + $0x3b0] ss:$8 sps:$4 sm:$0xff]  }
  0xac   : > { %937 = vmatpush1.bf16.msra.mxu0 %v2220_v15  ;;  %v2294_v15 = vld [vmem:[#allocation5 + $0x3a4] ss:$8 sps:$4 sm:$0xff]  }
  0xad   : > { %938 = vmatprep.subr.bf16.mxu0 %v2225_v16  ;;  %v2292_v16 = vld [vmem:[#allocation5 + $0x3a0] ss:$8 sps:$4 sm:$0xff]  }
  0xb0   : > { %939 = vmatpush1.bf16.msra.mxu0 %v2223_v17  ;;  %v503_v17 = vld [vmem:[#allocation7 + $0x2] sm:$0x3] }
  0xb1   : > { %940 = vmatprep.subr.bf16.mxu0 %v2228_v18  ;;  %v508_v18 = vrot.slane %v503_v17, %v2711_v34 }
  0xb4   : > { %941 = vmatpush1.bf16.msra.mxu0 %v2226_v19  ;;  %v512_v19 = vrot.slane %v503_v17, %v2713_v36  ;;  %v2349_v17 = vld [vmem:[#allocation5 + $0x570] ss:$8 sps:$4 sm:$0xff]  }
  0xb5   : > { %942 = vmatprep.subr.bf16.mxu0 %v2231_v20 }
  0xb8   : > { %943 = vmatpush2.bf16.msra.mxu0 %v2229_v21 }
  0xb9   : > { %944 = vmatprep.subr.bf16.mxu0 %v2234_v22 }
  0xbc   : > { %945 = vmatpush2.bf16.msra.mxu0 %v2232_v23 }
  0xbd   : > { %946 = vmatprep.subr.bf16.mxu0 %v2237_v24 }
  0xc0   : > { %947 = vmatpush2.bf16.msra.mxu0 %v2235_v25 }
  0xc1   : > { %948 = vmatprep.subr.bf16.mxu0 %v2240_v26 }
  0xc4   : > { %949 = vmatpush2.bf16.msra.mxu0 %v2238_v27 }
  0xc5   : > { %950 = vmatprep.subr.bf16.mxu0 %v2243_v28 }
  0xc8   : > { %951 = vmatpush2.bf16.msra.mxu0 %v2241_v29 }
  0xc9   : > { %952 = vmatprep.subr.bf16.mxu0 %v2246_v30  ;;  %v2297_v30 = vld [vmem:[#allocation5 + $0x394] ss:$8 sps:$4 sm:$0xff]  }
  0xcc   : > { %953 = vmatpush2.bf16.msra.mxu0 %v2244_v31  ;;  %v2295_v31 = vld [vmem:[#allocation5 + $0x390] ss:$8 sps:$4 sm:$0xff]  }
  0xcd   : > { %954 = vmatprep.subr.bf16.mxu0 %v2249_v49  ;;  %v2319_v49 = vld [vmem:[#allocation5 + $0x410] ss:$8 sps:$4 sm:$0xff]  }
  0xd0   : > { %955 = vmatpush2.bf16.msra.mxu0 %v2247_v50  ;;  %v2324_v50 = vld [vmem:[#allocation5 + $0x404] ss:$8 sps:$4 sm:$0xff]  }
  0xd1   : > { %956 = vmatprep.subr.bf16.mxu0 %v2252_v51  ;;  %v2322_v51 = vld [vmem:[#allocation5 + $0x400] ss:$8 sps:$4 sm:$0xff]  }
  0xd4   : > { %957 = vmatpush2.bf16.msra.mxu0 %v2250_v52  ;;  %v2327_v52 = vld [vmem:[#allocation5 + $0x4f4] ss:$8 sps:$4 sm:$0xff]  }
 0x157   : > { %v458_v39 = vpop.f32.mrf.mxu0 }
 0x158   : > { %v459_v40 = vadd.f32 %v458_v39, %v257_v37  ;;  %v2303_v37 = vld [vmem:[#allocation5 + $0x474] ss:$8 sps:$4 sm:$0xff]   ;;  %v2304_v39 = vld [vmem:[#allocation5 + $0x460] ss:$8 sps:$4 sm:$0xff]  }
 0x159   : > { %v460_v41 = vpop.f32.mrf.mxu0  ;;  %1428 = vmatprep.subr.bf16.mxu0 %v2303_v37  ;;  %v2378_v37 = vld [vmem:[#allocation5 + $0x5e4] ss:$8 sps:$4 sm:$0xff]  }
 0x15a   : > { %v461_v42 = vadd.f32 %v460_v41, %v261_v38  ;;  %v465_v43 = vmax.f32 %v459_v40, 0.0  ;;  %v2306_v38 = vld [vmem:[#allocation5 + $0x464] ss:$8 sps:$4 sm:$0xff]   ;;  %v2309_v40 = vld [vmem:[#allocation5 + $0x454] ss:$8 sps:$4 sm:$0xff]  }
 0x15b   : > { %v462_v44 = vpop.f32.mrf.mxu0  ;;  %v2307_v41 = vld [vmem:[#allocation5 + $0x450] ss:$8 sps:$4 sm:$0xff]  }
 0x15c   : > { %v466_v45 = vmax.f32 %v461_v42, 0.0  ;;  %v467_v48 = vpack.c.bf16 %v465_v43, %v465_v43  ;;  %v2312_v42 = vld [vmem:[#allocation5 + $0x444] ss:$8 sps:$4 sm:$0xff]   ;;  %v2310_v43 = vld [vmem:[#allocation5 + $0x440] ss:$8 sps:$4 sm:$0xff]  }
 0x15d   : > { %v463_v46 = vpop.f32.mrf.mxu0  ;;  %v2315_v44 = vld [vmem:[#allocation5 + $0x434] ss:$8 sps:$4 sm:$0xff]  }
 0x15e   : > { %v468_v47 = vpack.c.bf16 %v466_v45, %v466_v45  ;;  %v2313_v45 = vld [vmem:[#allocation5 + $0x430] ss:$8 sps:$4 sm:$0xff]   ;;  %v2318_v46 = vld [vmem:[#allocation5 + $0x424] ss:$8 sps:$4 sm:$0xff]  }
 0x160   : > { %707 = vmatprep.mubr.bf16.mxu1 %v468_v47  ;;  %v2316_v47 = vld [vmem:[#allocation5 + $0x420] ss:$8 sps:$4 sm:$0xff]  }
 0x161   : > { %708 = vmatmul.mubr.bf16.vlgmr.msra.gmra.mxu1 %v467_v48  ;;  %v2321_v48 = vld [vmem:[#allocation5 + $0x414] ss:$8 sps:$4 sm:$0xff]  }
 0x162   : > { %1178 = vmatpush1.bf16.msra.mxu1 %v2253_v53  ;;  %v2325_v53 = vld [vmem:[#allocation5 + $0x4f0] ss:$8 sps:$4 sm:$0xff]  }
 0x163   : > { %1179 = vmatprep.subr.bf16.mxu1 %v2258_v55  ;;  %v2328_v55 = vld [vmem:[#allocation5 + $0x4e0] ss:$8 sps:$4 sm:$0xff]  }
 0x166   : > { %1180 = vmatpush1.bf16.msra.mxu1 %v2256_v56  ;;  %v2333_v56 = vld [vmem:[#allocation5 + $0x4d4] ss:$8 sps:$4 sm:$0xff]  }
 0x167   : > { %1181 = vmatprep.subr.bf16.mxu1 %v2261_v57  ;;  %v2331_v57 = vld [vmem:[#allocation5 + $0x4d0] ss:$8 sps:$4 sm:$0xff]  }
 0x16a   : > { %1182 = vmatpush1.bf16.msra.mxu1 %v2259_v58  ;;  %v2336_v58 = vld [vmem:[#allocation5 + $0x4c4] ss:$8 sps:$4 sm:$0xff]  }
 0x16b   : > { %1183 = vmatprep.subr.bf16.mxu1 %v2264_v59  ;;  %v2334_v59 = vld [vmem:[#allocation5 + $0x4c0] ss:$8 sps:$4 sm:$0xff]  }
 0x16e   : > { %1184 = vmatpush1.bf16.msra.mxu1 %v2262_v60  ;;  %v2339_v60 = vld [vmem:[#allocation5 + $0x4b4] ss:$8 sps:$4 sm:$0xff]  }
 0x16f   : > { %1185 = vmatprep.subr.bf16.mxu1 %v2267_v61  ;;  %v2337_v61 = vld [vmem:[#allocation5 + $0x4b0] ss:$8 sps:$4 sm:$0xff]  }
 0x172   : > { %1186 = vmatpush1.bf16.msra.mxu1 %v2265_v62  ;;  %v2342_v62 = vld [vmem:[#allocation5 + $0x4a4] ss:$8 sps:$4 sm:$0xff]  }
 0x173   : > { %1187 = vmatprep.subr.bf16.mxu1 %v2270_v63  ;;  %v2340_v63 = vld [vmem:[#allocation5 + $0x4a0] ss:$8 sps:$4 sm:$0xff]  }
 0x176   : > { %1188 = vmatpush1.bf16.msra.mxu1 %v2268_v0  ;;  %v754_v0 = vld [vmem:[#allocation7 + $0x4] sm:$0x3] }
 0x177   : > { %1189 = vmatprep.subr.bf16.mxu1 %v2273_v1  ;;  %v759_v1 = vrot.slane %v754_v0, %v2711_v34 }
 0x17a   : > { %1190 = vmatpush1.bf16.msra.mxu1 %v2271_v2  ;;  %v763_v2 = vrot.slane %v754_v0, %v2713_v36  ;;  %v1256_v0 = vld [vmem:[#allocation7 + $0x8] sm:$0x3] }
 0x17b   : > { %1191 = vmatprep.subr.bf16.mxu1 %v2276_v3 }
 0x17e   : > { %1192 = vmatpush1.bf16.msra.mxu1 %v2274_v4 }
 0x17f   : > { %1193 = vmatprep.subr.bf16.mxu1 %v2279_v5 }
 0x182   : > { %1194 = vmatpush2.bf16.msra.mxu1 %v2277_v6 }
 0x183   : > { %1195 = vmatprep.subr.bf16.mxu1 %v2282_v7 }
 0x186   : > { %1196 = vmatpush2.bf16.msra.mxu1 %v2280_v8 }
 0x187   : > { %1197 = vmatprep.subr.bf16.mxu1 %v2285_v9 }
 0x18a   : > { %1198 = vmatpush2.bf16.msra.mxu1 %v2283_v10 }
 0x18b   : > { %1199 = vmatprep.subr.bf16.mxu1 %v2288_v11 }
 0x18e   : > { %1200 = vmatpush2.bf16.msra.mxu1 %v2286_v12 }
 0x18f   : > { %1201 = vmatprep.subr.bf16.mxu1 %v2291_v13  ;;  %v2345_v13 = vld [vmem:[#allocation5 + $0x494] ss:$8 sps:$4 sm:$0xff]  }
 0x192   : > { %1202 = vmatpush2.bf16.msra.mxu1 %v2289_v14  ;;  %v2343_v14 = vld [vmem:[#allocation5 + $0x490] ss:$8 sps:$4 sm:$0xff]  }
 0x193   : > { %1203 = vmatprep.subr.bf16.mxu1 %v2294_v15  ;;  %v2348_v15 = vld [vmem:[#allocation5 + $0x484] ss:$8 sps:$4 sm:$0xff]  }
 0x196   : > { %1204 = vmatpush2.bf16.msra.mxu1 %v2292_v16  ;;  %v2346_v16 = vld [vmem:[#allocation5 + $0x480] ss:$8 sps:$4 sm:$0xff]  }
 0x197   : > { %1205 = vmatprep.subr.bf16.mxu1 %v2297_v30  ;;  %v2367_v30 = vld [vmem:[#allocation5 + $0x510] ss:$8 sps:$4 sm:$0xff]  }
 0x19a   : > { %1206 = vmatpush2.bf16.msra.mxu1 %v2295_v31  ;;  %v2372_v31 = vld [vmem:[#allocation5 + $0x504] ss:$8 sps:$4 sm:$0xff]  }
 0x19b   : > { %1207 = vmatprep.subr.bf16.mxu1 %v2300_v32  ;;  %v2370_v32 = vld [vmem:[#allocation5 + $0x500] ss:$8 sps:$4 sm:$0xff]  }
 0x19e   : > { %1208 = vmatpush2.bf16.msra.mxu1 %v2298_v33  ;;  %v2375_v33 = vld [vmem:[#allocation5 + $0x5f4] ss:$8 sps:$4 sm:$0xff]  }
 0x221   : > { %v709_v20 = vpop.f32.mrf.mxu1 }
 0x222   : > { %v710_v21 = vadd.f32 %v709_v20, %v508_v18  ;;  %v2351_v18 = vld [vmem:[#allocation5 + $0x574] ss:$8 sps:$4 sm:$0xff]   ;;  %v2352_v20 = vld [vmem:[#allocation5 + $0x560] ss:$8 sps:$4 sm:$0xff]  }
 0x223   : > { %v711_v22 = vpop.f32.mrf.mxu1  ;;  %1679 = vmatprep.subr.bf16.mxu1 %v2351_v18 }
 0x224   : > { %v712_v23 = vadd.f32 %v711_v22, %v512_v19  ;;  %v716_v24 = vmax.f32 %v710_v21, 0.0  ;;  %v2354_v19 = vld [vmem:[#allocation5 + $0x564] ss:$8 sps:$4 sm:$0xff]   ;;  %v2357_v21 = vld [vmem:[#allocation5 + $0x554] ss:$8 sps:$4 sm:$0xff]  }
 0x225   : > { %v713_v25 = vpop.f32.mrf.mxu1  ;;  %v2355_v22 = vld [vmem:[#allocation5 + $0x550] ss:$8 sps:$4 sm:$0xff]  }
 0x226   : > { %v717_v26 = vmax.f32 %v712_v23, 0.0  ;;  %v718_v29 = vpack.c.bf16 %v716_v24, %v716_v24  ;;  %v2360_v23 = vld [vmem:[#allocation5 + $0x544] ss:$8 sps:$4 sm:$0xff]   ;;  %v2358_v24 = vld [vmem:[#allocation5 + $0x540] ss:$8 sps:$4 sm:$0xff]  }
 0x227   : > { %v714_v27 = vpop.f32.mrf.mxu1  ;;  %v2363_v25 = vld [vmem:[#allocation5 + $0x534] ss:$8 sps:$4 sm:$0xff]  }
 0x228   : > { %v719_v28 = vpack.c.bf16 %v717_v26, %v717_v26  ;;  %v2361_v26 = vld [vmem:[#allocation5 + $0x530] ss:$8 sps:$4 sm:$0xff]   ;;  %v2366_v27 = vld [vmem:[#allocation5 + $0x524] ss:$8 sps:$4 sm:$0xff]  }
 0x22a   : > { %958 = vmatprep.mubr.bf16.mxu0 %v719_v28  ;;  %v2364_v28 = vld [vmem:[#allocation5 + $0x520] ss:$8 sps:$4 sm:$0xff]  }
 0x22b   : > { %959 = vmatmul.mubr.bf16.vlgmr.msra.gmra.mxu0 %v718_v29  ;;  %v2369_v29 = vld [vmem:[#allocation5 + $0x514] ss:$8 sps:$4 sm:$0xff]  }
 0x22c   : > { %1429 = vmatpush1.bf16.msra.mxu0 %v2301_v35  ;;  %v2373_v35 = vld [vmem:[#allocation5 + $0x5f0] ss:$8 sps:$4 sm:$0xff]  }
 0x22d   : > { %1430 = vmatprep.subr.bf16.mxu0 %v2306_v38  ;;  %v2376_v38 = vld [vmem:[#allocation5 + $0x5e0] ss:$8 sps:$4 sm:$0xff]  }
 0x230   : > { %1431 = vmatpush1.bf16.msra.mxu0 %v2304_v39  ;;  %v2381_v39 = vld [vmem:[#allocation5 + $0x5d4] ss:$8 sps:$4 sm:$0xff]  }
 0x231   : > { %1432 = vmatprep.subr.bf16.mxu0 %v2309_v40  ;;  %v2379_v40 = vld [vmem:[#allocation5 + $0x5d0] ss:$8 sps:$4 sm:$0xff]  }
 0x234   : > { %1433 = vmatpush1.bf16.msra.mxu0 %v2307_v41  ;;  %v2384_v41 = vld [vmem:[#allocation5 + $0x5c4] ss:$8 sps:$4 sm:$0xff]  }
 0x235   : > { %1434 = vmatprep.subr.bf16.mxu0 %v2312_v42  ;;  %v2382_v42 = vld [vmem:[#allocation5 + $0x5c0] ss:$8 sps:$4 sm:$0xff]  }
 0x238   : > { %1435 = vmatpush1.bf16.msra.mxu0 %v2310_v43  ;;  %v2387_v43 = vld [vmem:[#allocation5 + $0x5b4] ss:$8 sps:$4 sm:$0xff]  }
 0x239   : > { %1436 = vmatprep.subr.bf16.mxu0 %v2315_v44  ;;  %v2385_v44 = vld [vmem:[#allocation5 + $0x5b0] ss:$8 sps:$4 sm:$0xff]  }
 0x23c   : > { %1437 = vmatpush1.bf16.msra.mxu0 %v2313_v45  ;;  %v2390_v45 = vld [vmem:[#allocation5 + $0x5a4] ss:$8 sps:$4 sm:$0xff]  }
 0x23d   : > { %1438 = vmatprep.subr.bf16.mxu0 %v2318_v46  ;;  %v2388_v46 = vld [vmem:[#allocation5 + $0x5a0] ss:$8 sps:$4 sm:$0xff]  }
 0x240   : > { %1439 = vmatpush1.bf16.msra.mxu0 %v2316_v47  ;;  %v1005_v47 = vld [vmem:[#allocation7 + $0x6] sm:$0x3] }
 0x241   : > { %1440 = vmatprep.subr.bf16.mxu0 %v2321_v48  ;;  %v1010_v48 = vrot.slane %v1005_v47, %v2711_v34 }
 0x244   : > { %1441 = vmatpush1.bf16.msra.mxu0 %v2319_v49  ;;  %v1014_v49 = vrot.slane %v1005_v47, %v2713_v36 }
 0x245   : > { %1442 = vmatprep.subr.bf16.mxu0 %v2324_v50 }
 0x248   : > { %1443 = vmatpush1.bf16.msra.mxu0 %v2322_v51 }
 0x249   : > { %1444 = vmatprep.subr.bf16.mxu0 %v2327_v52 }
 0x24c   : > { %1445 = vmatpush2.bf16.msra.mxu0 %v2325_v53 }
 0x24d   : > { %1446 = vmatprep.subr.bf16.mxu0 %v2330_v54 }
 0x250   : > { %1447 = vmatpush2.bf16.msra.mxu0 %v2328_v55 }
 0x251   : > { %1448 = vmatprep.subr.bf16.mxu0 %v2333_v56 }
 0x254   : > { %1449 = vmatpush2.bf16.msra.mxu0 %v2331_v57 }
 0x255   : > { %1450 = vmatprep.subr.bf16.mxu0 %v2336_v58 }
 0x258   : > { %1451 = vmatpush2.bf16.msra.mxu0 %v2334_v59 }
 0x259   : > { %1452 = vmatprep.subr.bf16.mxu0 %v2339_v60  ;;  %v2393_v60 = vld [vmem:[#allocation5 + $0x594] ss:$8 sps:$4 sm:$0xff]  }
 0x25c   : > { %1453 = vmatpush2.bf16.msra.mxu0 %v2337_v61  ;;  %v2391_v61 = vld [vmem:[#allocation5 + $0x590] ss:$8 sps:$4 sm:$0xff]  }
 0x25d   : > { %1454 = vmatprep.subr.bf16.mxu0 %v2342_v62  ;;  %v2396_v62 = vld [vmem:[#allocation5 + $0x584] ss:$8 sps:$4 sm:$0xff]  }
 0x260   : > { %1455 = vmatpush2.bf16.msra.mxu0 %v2340_v63  ;;  %v2394_v63 = vld [vmem:[#allocation5 + $0x580] ss:$8 sps:$4 sm:$0xff]  }
 0x261   : > { %1456 = vmatprep.subr.bf16.mxu0 %v2345_v13  ;;  %v1507_v13 = vld [vmem:[#allocation7 + $0xa] sm:$0x3] }
 0x264   : > { %1457 = vmatpush2.bf16.msra.mxu0 %v2343_v14  ;;  %v1512_v14 = vrot.slane %v1507_v13, %v2711_v34 }
 0x265   : > { %1458 = vmatprep.subr.bf16.mxu0 %v2348_v15  ;;  %v1516_v15 = vrot.slane %v1507_v13, %v2713_v36 }
 0x268   : > { %1459 = vmatpush2.bf16.msra.mxu0 %v2346_v16 }
 0x2eb   : > { %v960_v3 = vpop.f32.mrf.mxu0 }
 0x2ec   : > { %v961_v4 = vadd.f32 %v960_v3, %v759_v1  ;;  %v1261_v1 = vrot.slane %v1256_v0, %v2711_v34 }
 0x2ed   : > { %v962_v5 = vpop.f32.mrf.mxu0 }
 0x2ee   : > { %v963_v6 = vadd.f32 %v962_v5, %v763_v2  ;;  %v967_v7 = vmax.f32 %v961_v4, 0.0  ;;  %v1265_v2 = vrot.slane %v1256_v0, %v2713_v36 }
 0x2ef   : > { %v964_v8 = vpop.f32.mrf.mxu0 }
 0x2f0   : > { %v968_v9 = vmax.f32 %v963_v6, 0.0  ;;  %v969_v12 = vpack.c.bf16 %v967_v7, %v967_v7 }
 0x2f1   : > { %v965_v10 = vpop.f32.mrf.mxu0 }
 0x2f2   : > { %v970_v11 = vpack.c.bf16 %v968_v9, %v968_v9 }
 0x2f4   : > { %1209 = vmatprep.mubr.bf16.mxu1 %v970_v11 }
 0x2f5   : > { %1210 = vmatmul.mubr.bf16.vlgmr.msra.gmra.mxu1 %v969_v12 }
 0x2f6   : > { %1680 = vmatpush1.bf16.msra.mxu1 %v2349_v17 }
 0x2f7   : > { %1681 = vmatprep.subr.bf16.mxu1 %v2354_v19 }
 0x2fa   : > { %1682 = vmatpush1.bf16.msra.mxu1 %v2352_v20 }
 0x2fb   : > { %1683 = vmatprep.subr.bf16.mxu1 %v2357_v21 }
 0x2fe   : > { %1684 = vmatpush1.bf16.msra.mxu1 %v2355_v22 }
 0x2ff   : > { %1685 = vmatprep.subr.bf16.mxu1 %v2360_v23 }
 0x302   : > { %1686 = vmatpush1.bf16.msra.mxu1 %v2358_v24 }
 0x303   : > { %1687 = vmatprep.subr.bf16.mxu1 %v2363_v25 }
 0x306   : > { %1688 = vmatpush1.bf16.msra.mxu1 %v2361_v26 }
 0x307   : > { %1689 = vmatprep.subr.bf16.mxu1 %v2366_v27 }
 0x30a   : > { %1690 = vmatpush1.bf16.msra.mxu1 %v2364_v28 }
 0x30b   : > { %1691 = vmatprep.subr.bf16.mxu1 %v2369_v29 }
 0x30e   : > { %1692 = vmatpush1.bf16.msra.mxu1 %v2367_v30 }
 0x30f   : > { %1693 = vmatprep.subr.bf16.mxu1 %v2372_v31 }
 0x312   : > { %1694 = vmatpush1.bf16.msra.mxu1 %v2370_v32 }
 0x313   : > { %1695 = vmatprep.subr.bf16.mxu1 %v2375_v33 }
 0x316   : > { %1696 = vmatpush2.bf16.msra.mxu1 %v2373_v35 }
 0x317   : > { %1697 = vmatprep.subr.bf16.mxu1 %v2378_v37 }
 0x31a   : > { %1698 = vmatpush2.bf16.msra.mxu1 %v2376_v38 }
 0x31b   : > { %1699 = vmatprep.subr.bf16.mxu1 %v2381_v39 }
 0x31e   : > { %1700 = vmatpush2.bf16.msra.mxu1 %v2379_v40 }
 0x31f   : > { %1701 = vmatprep.subr.bf16.mxu1 %v2384_v41 }
 0x322   : > { %1702 = vmatpush2.bf16.msra.mxu1 %v2382_v42 }
 0x323   : > { %1703 = vmatprep.subr.bf16.mxu1 %v2387_v43 }
 0x326   : > { %1704 = vmatpush2.bf16.msra.mxu1 %v2385_v44 }
 0x327   : > { %1705 = vmatprep.subr.bf16.mxu1 %v2390_v45 }
 0x32a   : > { %1706 = vmatpush2.bf16.msra.mxu1 %v2388_v46 }
 0x32b   : > { %1707 = vmatprep.subr.bf16.mxu1 %v2393_v60 }
 0x32e   : > { %1708 = vmatpush2.bf16.msra.mxu1 %v2391_v61 }
 0x32f   : > { %1709 = vmatprep.subr.bf16.mxu1 %v2396_v62 }
 0x332   : > { %1710 = vmatpush2.bf16.msra.mxu1 %v2394_v63 }
 0x3b5   : > { %v1211_v50 = vpop.f32.mrf.mxu1 }
 0x3b6   : > { %v1212_v51 = vadd.f32 %v1211_v50, %v1010_v48 }
 0x3b7   : > { %v1213_v52 = vpop.f32.mrf.mxu1 }
 0x3b8   : > { %v1214_v53 = vadd.f32 %v1213_v52, %v1014_v49  ;;  %v1218_v54 = vmax.f32 %v1212_v51, 0.0 }
 0x3b9   : > { %v1215_v55 = vpop.f32.mrf.mxu1 }
 0x3ba   : > { %v1219_v56 = vmax.f32 %v1214_v53, 0.0  ;;  %v1220_v59 = vpack.c.bf16 %v1218_v54, %v1218_v54 }
 0x3bb   : > { %v1216_v57 = vpop.f32.mrf.mxu1 }
 0x3bc   : > { %v1221_v58 = vpack.c.bf16 %v1219_v56, %v1219_v56 }
 0x3be   : > { %1460 = vmatprep.mubr.bf16.mxu0 %v1221_v58 }
 0x3bf   : > { %1461 = vmatmul.mubr.bf16.vlgmr.msra.gmra.mxu0 %v1220_v59 }
 0x47f   : > { %v1462_v3 = vpop.f32.mrf.mxu0 }
 0x480   : > { %v1463_v4 = vadd.f32 %v1462_v3, %v1261_v1 }
 0x481   : > { %v1464_v5 = vpop.f32.mrf.mxu0 }
 0x482   : > { %v1465_v6 = vadd.f32 %v1464_v5, %v1265_v2  ;;  %v1469_v7 = vmax.f32 %v1463_v4, 0.0 }
 0x483   : > { %v1466_v8 = vpop.f32.mrf.mxu0 }
 0x484   : > { %v1470_v9 = vmax.f32 %v1465_v6, 0.0  ;;  %v1471_v12 = vpack.c.bf16 %v1469_v7, %v1469_v7 }
 0x485   : > { %v1467_v10 = vpop.f32.mrf.mxu0 }
 0x486   : > { %v1472_v11 = vpack.c.bf16 %v1470_v9, %v1470_v9 }
 0x488   : > { %1711 = vmatprep.mubr.bf16.mxu1 %v1472_v11 }
 0x489   : > { %1712 = vmatmul.mubr.bf16.vlgmr.msra.gmra.mxu1 %v1471_v12 }
 0x549   : > { %v1713_v16 = vpop.f32.mrf.mxu1 }
 0x54a   : > { %v1714_v17 = vadd.f32 %v1713_v16, %v1512_v14 }
 0x54b   : > { %v1715_v18 = vpop.f32.mrf.mxu1 }
 0x54c   : > { %1720 = vst [vmem:[%s215_s20] sm:$0xff] %v1714_v17  ;;  %v1716_v19 = vadd.f32 %v1715_v18, %v1516_v15 }
 0x54d   : > { %v1717_v34 = vpop.f32.mrf.mxu1 }
 0x54e   : > { %1721 = vst [vmem:[%s215_s20 + $0x8] sm:$0xff] %v1716_v19 }
 0x54f   : > { %v1718_v36 = vpop.f32.mrf.mxu1 }
 0x550   : > { %2490 = shalt.err (!%p2487_p9)
}
 0x551   : > { %s2491_s23 = scalar_lea.hbm %s2733_s4, 256  ;;  %s2495_s25 = scalar_lea.hbm %s2779_s3, 512 }
 0x552   : > { %p2492_p13 = scmp.ne.s32.totalorder %s2733_s4, %s2491_s23  ;;  %p2496_p4 = scmp.lt.s32.totalorder %s2733_s4, %s2779_s3 }
 0x553   : > { %p2497_p8 = scmp.lt.s32.totalorder %s2495_s25, %s2491_s23 }
 0x554   : > { %p2493_p5 = pnand %p2492_p13, %p2795_p0 }
 0x555   : > { %p2498_p7 = por %p2497_p8, %p2496_p4 }
 0x556   : > { %p2494_p10 = pneg %p2493_p5 }
 0x558   : > { %p2499_p11 = pnand %p2498_p7, %p2494_p10 }
 0x55a   : > { %2502 = shalt.err (!%p2499_p11)
}
 0x55b   : > { %2048 = dma.vmem_to_hbm [thread:$0]  (%p2795_p0), %s2735_s27, 256, %s2733_s4, %s1723_s16  }
 0x55c PF: > { %s1749_s5 = sand.u32 1, %s2533_s12   ;;  %p2796_p1 = scmp.ne.s32.totalorder %s2785_s19, 0 }
 0x55d   : > { %p2797_p2 = scmp.ge.s32.totalorder %s2545_s15, 2  ;;  %s1750_s6 = scalar_lea.sflag [#allocation4], %s1749_s5 }
 0x55f   : > { %p2062_p6 = pnand %p2797_p2, %p2796_p1 }
 0x561   : > { %p2063_p12 = pneg %p2062_p6 }
 0x563   : > { %2528 = dma.done.wait (%p2063_p12), %s1750_s6, 256  }
 0x564   : > { %2530 = vsyncadd (%p2063_p12), %s1750_s6, 4294967040  ;;  %p17_p3 = scmp.ge.s32.totalorder %s2647_s9, 4   ;;  %s2798_s12 = smov %s2537_s13 }
 0x565   : > { %s2799_s13 = smov %s2541_s14  ;;  %s2800_s14 = smov %s2656_s17 }
 0x566   : > { %s2801_s15 = smov %s2647_s9  ;;  %19 = sbr.rel (!%p17_p3) target bundleno = 6 (0x6), region = 95 }
 0x56b   :  { %1755 = vsyncpa [#allocation3], 1 }
 0x56c   :  { %1757 = vsyncpa [#allocation3 + $0x1], 1 }
 0x56d   :  { %1758 = vsyncpa [#allocation6], 1 }
 0x56e   :  { %1759 = vsyncpa [#allocation4], 1 }
 0x56f   :  { %1761 = vsyncpa [#allocation4 + $0x1], 1 }

</bundles_post_ra>
